<compile_context>
chip_gen: v7x
topology: tpu7x:2x2x1
jax: 0.10.0
libtpu: 0.0.40
codegen_flags: <defaults>
</compile_context>

<pallas_src>
import numpy as np
import jax
import jax.numpy as jnp
from jax.experimental import pallas as pl
from jax.experimental.pallas import tpu as pltpu

_LANES = 128
_SUBLANES = 8
_MAX_TD = 8192                          # bounds the unrolled 128-lane strip loop
_INPUT_VMEM_BUDGET = 16 * 1024 * 1024   # double-buffered input bytes per step
_STEP_OVERHEAD_BYTES = 350_000          # ~0.35 us pipeline overhead @ ~1 TB/s


def _round_up(v, m):
    return ((v + m - 1) // m) * m


def _prep(a):
    """Keep TPU-native float dtypes (f32/bf16/f16) on the wire; cast the rest
    to f32.  The kernel upcasts to f32 in-vreg, so compute is f32 everywhere
    (required on v5e, which has no bf16 VALU)."""
    a = jnp.asarray(a)
    if a.dtype in (jnp.float32, jnp.bfloat16, jnp.float16):
        return a
    return a.astype(jnp.float32)


def _pad2d(a, rows, cols):
    r, c = a.shape
    if r == rows and c == cols:
        return a                        # common aligned case: no extra HBM copy
    return jnp.pad(a, ((0, rows - r), (0, cols - c)))


def _choose_rows(n):
    """Row tile / padded row count.  n <= 128 -> full-dim block (exempt from
    the 8-sublane rule), zero row padding.  Otherwise pad to a multiple of 8
    (< 8 wasted rows) and tile with the largest multiple of 8 that divides it."""
    if n <= 128:
        return n, n
    n_pad = _round_up(n, _SUBLANES)
    tn = _SUBLANES
    for cand in range(_SUBLANES, 129, _SUBLANES):
        if n_pad % cand == 0:
            tn = cand
    return tn, n_pad


def _choose_td(d_pad, cap_lanes, bytes_per_lane):
    """Feature tile.  Score every multiple of 128 up to the VMEM cap by
    (padded lanes streamed + per-grid-step overhead), so exact divisors of
    d_pad (zero wasted DMA) are preferred but tiny tiles are not."""
    cap = int(min(cap_lanes, _MAX_TD, d_pad))
    cap = max(_LANES, (cap // _LANES) * _LANES)
    ovh = int(np.clip(_STEP_OVERHEAD_BYTES // max(bytes_per_lane, 1),
                      _LANES, _MAX_TD))
    best_key, best = None, None
    for td in range(_LANES, cap + 1, _LANES):
        d_grid = _round_up(d_pad, td)
        key = (d_grid + (d_grid // td) * ovh, -td)
        if best_key is None or key < best_key:
            best_key, best = key, (td, d_grid)
    return best


def _make_kernel(n_in, scale):
    """KL over a (TN, TD) block.  128-lane strips are upcast to f32 in-vreg,
    exp / 1-over-var go to the EUP, and per-row partial sums accumulate into
    the lane-dense (TN, 128) output block (bounded vreg pressure).  The static
    scale (sample_weight / D) is folded into the last reduction step."""
    def kernel(*refs):
        out_ref = refs[-1]
        in_refs = refs[:n_in]
        k = pl.program_id(2)

        @pl.when(k == 0)
        def _():
            out_ref[...] = jnp.zeros_like(out_ref)

        n_strips = in_refs[0].shape[-1] // _LANES
        for s in range(n_strips):
            sl = pl.ds(s * _LANES, _LANES)
            m1 = in_refs[0][:, sl].astype(jnp.float32)
            lv1 = in_refs[1][:, sl].astype(jnp.float32)
            var1 = jnp.exp(lv1)
            if n_in == 2:
                # KL(N(mean1, var1) || N(0, 1))
                kl = (-0.5) * (1.0 + lv1 - m1 * m1 - var1)
            else:
                m2 = in_refs[2][:, sl].astype(jnp.float32)
                lv2 = in_refs[3][:, sl].astype(jnp.float32)
                inv_var2 = jnp.exp(-lv2)        # 1/var2: one EUP op, no divide
                diff = m1 - m2
                kl = 0.5 * (lv2 - lv1 + (var1 + diff * diff) * inv_var2 - 1.0)
            out_ref[...] += kl

        if scale != 1.0:
            @pl.when(k == pl.num_programs(2) - 1)
            def _():
                out_ref[...] = out_ref[...] * scale
    return kernel


def _make_in_index_map(steps_per_group):
    def index_map(i, g, k):
        return (i, g * steps_per_group + k)
    return index_map


def _out_index_map(i, g, k):
    return (i, g)


def _lane_partial_sums(arrs, scale):
    """arrs: list of (N, D) arrays -> (N_pad, n_groups*128) f32 per-row
    partial sums, already multiplied by `scale`."""
    N, D = arrs[0].shape
    n_in = len(arrs)

    TN, N_pad = _choose_rows(max(N, 1))
    n_row_tiles = N_pad // TN

    itemsize = max(a.dtype.itemsize for a in arrs)
    D_pad = _round_up(max(D, 1), _LANES)
    cap_lanes = max(_LANES, _INPUT_VMEM_BUDGET // (n_in * 2 * TN * itemsize))
    TD, D_grid = _choose_td(D_pad, cap_lanes, n_in * TN * itemsize)
    n_steps_total = D_grid // TD

    # v7x: make sure there are >= 2 'parallel' programs when there is only one
    # row tile, by splitting the reduction into two 128-lane column groups.
    if n_row_tiles == 1 and n_steps_total == 1 and (TD // _LANES) % 2 == 0:
        TD //= 2
        n_steps_total = D_grid // TD
    n_groups = 2 if (n_row_tiles == 1 and n_steps_total >= 2
                     and n_steps_total % 2 == 0) else 1
    steps_per_group = n_steps_total // n_groups

    # Zero padding is exactly KL-neutral (mean=0, logvar=0 -> 0) in both the
    # prior and two-gaussian forms; do not change this without adding a mask.
    padded = [_pad2d(a, N_pad, D_grid) for a in arrs]
    in_map = _make_in_index_map(steps_per_group)

    return pl.pallas_call(
        _make_kernel(n_in, scale),
        out_shape=jax.ShapeDtypeStruct((N_pad, n_groups * _LANES), jnp.float32),
        grid_spec=pltpu.PrefetchScalarGridSpec(
            num_scalar_prefetch=0,
            grid=(n_row_tiles, n_groups, steps_per_group),
            in_specs=[pl.BlockSpec((TN, TD), in_map) for _ in padded],
            out_specs=pl.BlockSpec((TN, _LANES), _out_index_map),
        ),
        compiler_params=pltpu.CompilerParams(
            dimension_semantics=("parallel", "parallel", "arbitrary"),
            vmem_limit_bytes=32 * 1024 * 1024),
    )(*padded)


def kl_loss(mean1, logvar1, mean2=None, logvar2=None, *,
            reduction="mean", sample_weight=1.0):
    """Equivalent of KLLoss(reduction).forward(gauss1, gauss2, sample_weight),
    where gaussN is given by (meanN, logvarN) and var = exp(logvar).
    sample_weight: scalar (folded into the kernel) or an (N,)-broadcastable
    array (applied to the per-sample vector, like the reference)."""
    m1 = _prep(mean1)
    lv1 = _prep(logvar1)
    N = m1.shape[0]
    D = int(np.prod(m1.shape[1:])) if m1.ndim > 1 else 1
    arrs = [m1.reshape(N, D), lv1.reshape(N, D)]
    if mean2 is not None:
        arrs.append(_prep(mean2).reshape(N, D))
        arrs.append(_prep(logvar2).reshape(N, D))

    fold_weight = isinstance(sample_weight, (int, float)) and not isinstance(
        sample_weight, bool)
    scale = (float(sample_weight) if fold_weight else 1.0) / float(D)

    lane_sums = _lane_partial_sums(arrs, scale)

    # Per-sample mean over all non-batch dims (identity for 1-D inputs, where
    # D == 1, matching the reference's `if res.ndim > 1` branch).
    res = jnp.sum(lane_sums[:N, :], axis=-1)
    if not fold_weight:
        res = res * sample_weight
    if reduction == "sum":
        return jnp.sum(res)
    if reduction == "mean":
        return jnp.mean(res)
    return res  # reduction == 'none'


def _kl_loss_ref(mean1, logvar1, mean2=None, logvar2=None,
                 reduction="mean", sample_weight=1.0):
    v1 = jnp.exp(logvar1)
    if mean2 is None:
        res = -0.5 * (1.0 + logvar1 - mean1 ** 2 - v1)
    else:
        v2 = jnp.exp(logvar2)
        res = 0.5 * (logvar2 - logvar1 + (v1 + (mean1 - mean2) ** 2) / v2 - 1.0)
    if res.ndim > 1:
        res = res.mean(axis=tuple(range(1, res.ndim)))
    res = res * sample_weight
    if reduction == "sum":
        return jnp.sum(res)
    if reduction == "mean":
        return jnp.mean(res)
    return res


if __name__ == "__main__":
    key = jax.random.PRNGKey(0)
    ks = jax.random.split(key, 8)

    # Lane-aligned 4-D case (no padding at all), f32.
    N, C, H, W = 2, 4, 16, 16
    mean1 = jax.random.normal(ks[0], (N, C, H, W), dtype=jnp.float32)
    logvar1 = 0.5 * jax.random.normal(ks[1], (N, C, H, W), dtype=jnp.float32)
    mean2 = jax.random.normal(ks[2], (N, C, H, W), dtype=jnp.float32)
    logvar2 = 0.5 * jax.random.normal(ks[3], (N, C, H, W), dtype=jnp.float32)

    loss_prior = kl_loss(mean1, logvar1, reduction="mean")
    loss_pair = kl_loss(mean1, logvar1, mean2, logvar2, reduction="mean")

    # bf16 inputs stay bf16 on the wire (kernel upcasts to f32 in-vreg).
    loss_bf16 = kl_loss(mean1.astype(jnp.bfloat16), logvar1.astype(jnp.bfloat16),
                        mean2.astype(jnp.bfloat16), logvar2.astype(jnp.bfloat16),
                        reduction="sum")

    # Unaligned shape (row + lane padding paths), 'none' reduction + weight.
    m1s = jax.random.normal(ks[4], (3, 5, 21), dtype=jnp.float32)
    lv1s = 0.5 * jax.random.normal(ks[5], (3, 5, 21), dtype=jnp.float32)
    m2s = jax.random.normal(ks[6], (3, 5, 21), dtype=jnp.float32)
    lv2s = 0.5 * jax.random.normal(ks[7], (3, 5, 21), dtype=jnp.float32)
    loss_none = kl_loss(m1s, lv1s, m2s, lv2s, reduction="none",
                        sample_weight=0.5)

    jax.block_until_ready((loss_prior, loss_pair, loss_bf16, loss_none))

    ref_prior = _kl_loss_ref(mean1, logvar1, reduction="mean")
    ref_pair = _kl_loss_ref(mean1, logvar1, mean2, logvar2, reduction="mean")
    ref_bf16 = _kl_loss_ref(mean1.astype(jnp.bfloat16).astype(jnp.float32),
                            logvar1.astype(jnp.bfloat16).astype(jnp.float32),
                            mean2.astype(jnp.bfloat16).astype(jnp.float32),
                            logvar2.astype(jnp.bfloat16).astype(jnp.float32),
                            reduction="sum")
    ref_none = _kl_loss_ref(m1s, lv1s, m2s, lv2s, reduction="none",
                            sample_weight=0.5)

    np.testing.assert_allclose(np.asarray(loss_prior), np.asarray(ref_prior),
                               rtol=1e-4, atol=1e-5)
    np.testing.assert_allclose(np.asarray(loss_pair), np.asarray(ref_pair),
                               rtol=1e-4, atol=1e-5)
    np.testing.assert_allclose(np.asarray(loss_bf16), np.asarray(ref_bf16),
                               rtol=1e-3, atol=1e-3)
    np.testing.assert_allclose(np.asarray(loss_none), np.asarray(ref_none),
                               rtol=1e-4, atol=1e-5)
    print("KERNEL_OK")
</pallas_src>

<mosaic_0001>
module attributes {stable_mosaic.version = 11 : i64} {
  func.func @kernel(%arg0: i32, %arg1: i32, %arg2: i32, %arg3: memref<2x512xf32, #tpu.memory_space<vmem>>, %arg4: memref<2x512xf32, #tpu.memory_space<vmem>>, %arg5: memref<2x128xf32, #tpu.memory_space<vmem>>) attributes {dimension_semantics = [#tpu.dimension_semantics<parallel>, #tpu.dimension_semantics<parallel>, #tpu.dimension_semantics<arbitrary>], iteration_bounds = array<i64: 1, 2, 1>, scalar_prefetch = 0 : i64, scratch_operands = 0 : i64, tpu.core_type = #tpu.core_type<tc>, window_params = [{transform_indices = @transform_0, window_bounds = array<i64: 2, 512>}, {transform_indices = @transform_1, window_bounds = array<i64: 2, 512>}, {transform_indices = @transform_2, window_bounds = array<i64: 2, 128>}]} {
    %c0_i32 = arith.constant 0 : i32
    %0 = arith.cmpi eq, %arg2, %c0_i32 : i32
    %1 = arith.extui %0 : i1 to i32
    %c0_i32_0 = arith.constant 0 : i32
    %2 = arith.cmpi ne, %1, %c0_i32_0 : i32
    scf.if %2 {
      %cst_38 = arith.constant 0.000000e+00 : f32
      %58 = vector.broadcast %cst_38 : f32 to vector<2x128xf32>
      %c0_39 = arith.constant 0 : index
      %c0_40 = arith.constant 0 : index
      %59 = vector.load %arg5[%c0_39, %c0_40] : memref<2x128xf32, #tpu.memory_space<vmem>>, vector<2x128xf32>
      tpu.vector_store %arg5[%c0_39, %c0_40], %58 {strides = array<i32>} : memref<2x128xf32, #tpu.memory_space<vmem>>, vector<2x128xf32>,
    } else {
    }
    %c0 = arith.constant 0 : index
    %c0_1 = arith.constant 0 : index
    %3 = vector.load %arg3[%c0, %c0_1] : memref<2x512xf32, #tpu.memory_space<vmem>>, vector<2x128xf32>
    %c0_2 = arith.constant 0 : index
    %c0_3 = arith.constant 0 : index
    %4 = vector.load %arg4[%c0_2, %c0_3] : memref<2x512xf32, #tpu.memory_space<vmem>>, vector<2x128xf32>
    %5 = math.exp %4 : vector<2x128xf32>
    %cst = arith.constant 1.000000e+00 : f32
    %6 = vector.broadcast %cst : f32 to vector<2x128xf32>
    %7 = arith.addf %6, %4 : vector<2x128xf32>
    %8 = arith.mulf %3, %3 : vector<2x128xf32>
    %9 = arith.subf %7, %8 : vector<2x128xf32>
    %10 = arith.subf %9, %5 : vector<2x128xf32>
    %cst_4 = arith.constant -5.000000e-01 : f32
    %11 = vector.broadcast %cst_4 : f32 to vector<2x128xf32>
    %12 = arith.mulf %11, %10 : vector<2x128xf32>
    %c0_5 = arith.constant 0 : index
    %c0_6 = arith.constant 0 : index
    %13 = vector.load %arg5[%c0_5, %c0_6] : memref<2x128xf32, #tpu.memory_space<vmem>>, vector<2x128xf32>
    %14 = arith.addf %13, %12 : vector<2x128xf32>
    %c0_7 = arith.constant 0 : index
    %c0_8 = arith.constant 0 : index
    %15 = vector.load %arg5[%c0_7, %c0_8] : memref<2x128xf32, #tpu.memory_space<vmem>>, vector<2x128xf32>
    tpu.vector_store %arg5[%c0_7, %c0_8], %14 {strides = array<i32>} : memref<2x128xf32, #tpu.memory_space<vmem>>, vector<2x128xf32>,
    %c0_9 = arith.constant 0 : index
    %c128 = arith.constant 128 : index
    %16 = vector.load %arg3[%c0_9, %c128] : memref<2x512xf32, #tpu.memory_space<vmem>>, vector<2x128xf32>
    %c0_10 = arith.constant 0 : index
    %c128_11 = arith.constant 128 : index
    %17 = vector.load %arg4[%c0_10, %c128_11] : memref<2x512xf32, #tpu.memory_space<vmem>>, vector<2x128xf32>
    %18 = math.exp %17 : vector<2x128xf32>
    %cst_12 = arith.constant 1.000000e+00 : f32
    %19 = vector.broadcast %cst_12 : f32 to vector<2x128xf32>
    %20 = arith.addf %19, %17 : vector<2x128xf32>
    %21 = arith.mulf %16, %16 : vector<2x128xf32>
    %22 = arith.subf %20, %21 : vector<2x128xf32>
    %23 = arith.subf %22, %18 : vector<2x128xf32>
    %cst_13 = arith.constant -5.000000e-01 : f32
    %24 = vector.broadcast %cst_13 : f32 to vector<2x128xf32>
    %25 = arith.mulf %24, %23 : vector<2x128xf32>
    %c0_14 = arith.constant 0 : index
    %c0_15 = arith.constant 0 : index
    %26 = vector.load %arg5[%c0_14, %c0_15] : memref<2x128xf32, #tpu.memory_space<vmem>>, vector<2x128xf32>
    %27 = arith.addf %26, %25 : vector<2x128xf32>
    %c0_16 = arith.constant 0 : index
    %c0_17 = arith.constant 0 : index
    %28 = vector.load %arg5[%c0_16, %c0_17] : memref<2x128xf32, #tpu.memory_space<vmem>>, vector<2x128xf32>
    tpu.vector_store %arg5[%c0_16, %c0_17], %27 {strides = array<i32>} : memref<2x128xf32, #tpu.memory_space<vmem>>, vector<2x128xf32>,
    %c0_18 = arith.constant 0 : index
    %c256 = arith.constant 256 : index
    %29 = vector.load %arg3[%c0_18, %c256] : memref<2x512xf32, #tpu.memory_space<vmem>>, vector<2x128xf32>
    %c0_19 = arith.constant 0 : index
    %c256_20 = arith.constant 256 : index
    %30 = vector.load %arg4[%c0_19, %c256_20] : memref<2x512xf32, #tpu.memory_space<vmem>>, vector<2x128xf32>
    %31 = math.exp %30 : vector<2x128xf32>
    %cst_21 = arith.constant 1.000000e+00 : f32
    %32 = vector.broadcast %cst_21 : f32 to vector<2x128xf32>
    %33 = arith.addf %32, %30 : vector<2x128xf32>
    %34 = arith.mulf %29, %29 : vector<2x128xf32>
    %35 = arith.subf %33, %34 : vector<2x128xf32>
    %36 = arith.subf %35, %31 : vector<2x128xf32>
    %cst_22 = arith.constant -5.000000e-01 : f32
    %37 = vector.broadcast %cst_22 : f32 to vector<2x128xf32>
    %38 = arith.mulf %37, %36 : vector<2x128xf32>
    %c0_23 = arith.constant 0 : index
    %c0_24 = arith.constant 0 : index
    %39 = vector.load %arg5[%c0_23, %c0_24] : memref<2x128xf32, #tpu.memory_space<vmem>>, vector<2x128xf32>
    %40 = arith.addf %39, %38 : vector<2x128xf32>
    %c0_25 = arith.constant 0 : index
    %c0_26 = arith.constant 0 : index
    %41 = vector.load %arg5[%c0_25, %c0_26] : memref<2x128xf32, #tpu.memory_space<vmem>>, vector<2x128xf32>
    tpu.vector_store %arg5[%c0_25, %c0_26], %40 {strides = array<i32>} : memref<2x128xf32, #tpu.memory_space<vmem>>, vector<2x128xf32>,
    %c0_27 = arith.constant 0 : index
    %c384 = arith.constant 384 : index
    %42 = vector.load %arg3[%c0_27, %c384] : memref<2x512xf32, #tpu.memory_space<vmem>>, vector<2x128xf32>
    %c0_28 = arith.constant 0 : index
    %c384_29 = arith.constant 384 : index
    %43 = vector.load %arg4[%c0_28, %c384_29] : memref<2x512xf32, #tpu.memory_space<vmem>>, vector<2x128xf32>
    %44 = math.exp %43 : vector<2x128xf32>
    %cst_30 = arith.constant 1.000000e+00 : f32
    %45 = vector.broadcast %cst_30 : f32 to vector<2x128xf32>
    %46 = arith.addf %45, %43 : vector<2x128xf32>
    %47 = arith.mulf %42, %42 : vector<2x128xf32>
    %48 = arith.subf %46, %47 : vector<2x128xf32>
    %49 = arith.subf %48, %44 : vector<2x128xf32>
    %cst_31 = arith.constant -5.000000e-01 : f32
    %50 = vector.broadcast %cst_31 : f32 to vector<2x128xf32>
    %51 = arith.mulf %50, %49 : vector<2x128xf32>
    %c0_32 = arith.constant 0 : index
    %c0_33 = arith.constant 0 : index
    %52 = vector.load %arg5[%c0_32, %c0_33] : memref<2x128xf32, #tpu.memory_space<vmem>>, vector<2x128xf32>
    %53 = arith.addf %52, %51 : vector<2x128xf32>
    %c0_34 = arith.constant 0 : index
    %c0_35 = arith.constant 0 : index
    %54 = vector.load %arg5[%c0_34, %c0_35] : memref<2x128xf32, #tpu.memory_space<vmem>>, vector<2x128xf32>
    tpu.vector_store %arg5[%c0_34, %c0_35], %53 {strides = array<i32>} : memref<2x128xf32, #tpu.memory_space<vmem>>, vector<2x128xf32>,
    %c0_i32_36 = arith.constant 0 : i32
    %55 = arith.cmpi eq, %arg2, %c0_i32_36 : i32
    %56 = arith.extui %55 : i1 to i32
    %c0_i32_37 = arith.constant 0 : i32
    %57 = arith.cmpi ne, %56, %c0_i32_37 : i32
    scf.if %57 {
      %c0_38 = arith.constant 0 : index
      %c0_39 = arith.constant 0 : index
      %58 = vector.load %arg5[%c0_38, %c0_39] : memref<2x128xf32, #tpu.memory_space<vmem>>, vector<2x128xf32>
      %cst_40 = arith.constant 9.765625E-4 : f32
      %59 = vector.broadcast %cst_40 : f32 to vector<2x128xf32>
      %60 = arith.mulf %58, %59 : vector<2x128xf32>
      %c0_41 = arith.constant 0 : index
      %c0_42 = arith.constant 0 : index
      %61 = vector.load %arg5[%c0_41, %c0_42] : memref<2x128xf32, #tpu.memory_space<vmem>>, vector<2x128xf32>
      tpu.vector_store %arg5[%c0_41, %c0_42], %60 {strides = array<i32>} : memref<2x128xf32, #tpu.memory_space<vmem>>, vector<2x128xf32>,
    } else {
    }
    return
  }
  func.func @transform_0(%arg0: i32, %arg1: i32, %arg2: i32) -> (i32, i32) {
    %c1_i32 = arith.constant 1 : i32
    %0 = arith.muli %arg1, %c1_i32 : i32
    %1 = arith.addi %0, %arg2 : i32
    %c0_i32 = arith.constant 0 : i32
    return %arg0, %1 : i32, i32
  }
  func.func @transform_1(%arg0: i32, %arg1: i32, %arg2: i32) -> (i32, i32) {
    %c1_i32 = arith.constant 1 : i32
    %0 = arith.muli %arg1, %c1_i32 : i32
    %1 = arith.addi %0, %arg2 : i32
    %c0_i32 = arith.constant 0 : i32
    return %arg0, %1 : i32, i32
  }
  func.func @transform_2(%arg0: i32, %arg1: i32, %arg2: i32) -> (i32, i32) {
    %c0_i32 = arith.constant 0 : i32
    return %arg0, %arg1 : i32, i32
  }
}

</mosaic_0001>

<bundles_post_ra>
// kernel: tpu_custom_call.1
= control target key start
LH: loop header
LB: loop body
LE: loop exit
PB: predicated region body
PF: predicated region fallthrough
CT: control target
= control target key end

     0   :  { %7 = vsyncpa [#allocation3], 0  ;;  %s936_s0 = inlined_call_operand.hbm [shape: f32[2,1024], index: 0, kind: input, shape index: {}]   ;;  %s937_s1 = inlined_call_operand.hbm [shape: f32[2,1024], index: 1, kind: input, shape index: {}]   ;;  %s938_s2 = inlined_call_operand.hbm [shape: f32[2,256], index: 2, kind: output, shape index: {}]  }
   0x1   :  { %9 = vsyncpa [#allocation3 + $0x1], 0 }
   0x2   :  { %10 = vsyncpa [#allocation6], 0 }
   0x3   :  { %12 = vsyncpa [#allocation6 + $0x1], 0 }
   0x4   :  { %13 = vsyncpa [#allocation4], 0 }
   0x5   :  { %15 = vsyncpa [#allocation4 + $0x1], 0  ;;  %s689_s9 = smov 0   ;;  %s691_s10 = smov 0  }
   0x6   :  { %s693_s11 = smov 0   ;;  %s695_s12 = smov 0  }
   0x7   :  { %s697_s13 = smov 0   ;;  %s699_s14 = smov 0  }
   0x8 LB: > { %s426_s15 = sadd.s32 4294967295, %s668_s14   ;;  %s427_s16 = sadd.s32 4294967294, %s668_s14   ;;  %s668_s14 = sphi %s699_s14, %s21_s14   ;;  %s664_s13 = sphi %s697_s13, %s958_s13   ;;  %s660_s12 = sphi %s695_s12, %s957_s12   ;;  %s656_s11 = sphi %s693_s11, %s956_s11   ;;  %s652_s10 = sphi %s691_s10, %s955_s10   ;;  %s648_s9 = sphi %s689_s9, %s954_s9  }
   0x9   : > { %s36_s17 = sadd.s32 1, %s664_s13  ;;  %s51_s18 = sadd.s32 1, %s656_s11 }
   0xa   : > { %p38_p0 = scmp.ge.s32.totalorder %s36_s17, 2  ;;  %p58_p1 = scmp.ne.s32.totalorder %s656_s11, %s652_s10 }
   0xb   : > { %p59_p2 = scmp.eq.s32.totalorder %s668_s14, 0  ;;  %p64_p3 = scmp.ne.s32.totalorder %s652_s10, %s648_s9 }
   0xc   : > { %s960_s17 = smov (%p38_p0, %s36_s17), 0  ;;  %p65_p5 = scmp.eq.s32.totalorder %s426_s15, 0 }
   0xd   : > { %p730_p4 = por %p59_p2, %p58_p1  ;;  %s47_s20 = ssub.s32 %s664_s13, %s960_s17 }
   0xe   : > { %p120_p6 = scmp.eq.s32.totalorder %s426_s15, 1  ;;  %p49_p7 = scmp.eq.s32.totalorder %s47_s20, 0 }
   0xf   : > { %p736_p8 = por %p65_p5, %p64_p3  ;;  %p126_p10 = scmp.eq.s32.totalorder %s427_s16, 1 }
  0x10   : > { %p740_p9 = por %p120_p6, %p58_p1  ;;  %p463_p13 = scmp.lt.s32.totalorder %s668_s14, 2 }
  0x11   : > { %s942_s21 = scalar_select %p736_p8, 1, 0 }
  0x12   : > { %s943_s22 = scalar_select %p740_p9, 1, 0 }
  0x13   : > { %s745_s23 = scalar_select %p49_p7, %s656_s11, %s51_s18  }
  0x14   : > { %p747_p11 = por %p126_p10, %p64_p3  ;;  %s754_s25 = sand.u32 1, %s656_s11  }
  0x15   : > { %s430_s26 = sshll.u32 %s754_s25, 3  ;;  %s444_s27 = sshll.u32 %s664_s13, 7 }
  0x16   : > { %s944_s24 = scalar_select %p747_p11, 1, 0 }
  0x17   : > { %s763_s30 = scalar_lea.hbm %s936_s0, %s444_s27  ;;  %s150_s3 = scalar_lea.vmem [#allocation2], %s430_s26 }
  0x18   : > { %s161_s4 = sshll.u32 %s150_s3, 4  ;;  %p771_p0 = pnand %p463_p13, %p730_p4  ;;  %s767_s4 = int_to_ptr.vmem [resolvable:$true] %s161_s4 }
  0x19   : > { %s147_s6 = scalar_lea.sflag [#allocation3], %s754_s25  ;;  %s522_s7 = scalar_lea.hbm %s763_s30, 128 }
  0x1a   : > { %p523_p3 = scmp.ne.s32.totalorder %s763_s30, %s522_s7  ;;  %p524_p5 = pneg %p771_p0 }
  0x1b   : > { %s527_s16 = scalar_lea.hbm %s936_s0, 256  ;;  %p528_p4 = scmp.lt.u32.totalorder %s763_s30, %s936_s0 }
  0x1c   : > { %p525_p6 = pnand %p524_p5, %p523_p3  ;;  %p529_p10 = scmp.lt.u32.totalorder %s527_s16, %s522_s7 }
  0x1d   : > { %p531_p12 = scmp.lt.u32.totalorder %s522_s7, %s763_s30 }
  0x1e   : > { %p526_p7 = pneg %p525_p6  ;;  %p530_p13 = por %p529_p10, %p528_p4 }
  0x20   : > { %p532_p1 = por %p531_p12, %p530_p13 }
  0x22   : > { %p533_p2 = pnand %p532_p1, %p526_p7 }
  0x24   : > { %536 = shalt.err (!%p533_p2)
}
  0x25   : > { %s537_s20 = scalar_lea.vmem %s767_s4, 128  ;;  %s670_s28 = smov [#allocation2]  }
  0x26   : > { %p538_p3 = scmp.ne.s32.totalorder %s767_s4, %s537_s20  ;;  %s542_s29 = sshll.u32 %s670_s28, 4  ;;  %s543_s29 = int_to_ptr.vmem [resolvable:$false] %s542_s29 }
  0x27   : > { %s544_s3 = scalar_lea.vmem %s543_s29, 256  ;;  %p545_p9 = scmp.lt.s32.totalorder %s767_s4, %s543_s29 }
  0x28   : > { %p540_p6 = pnand %p538_p3, %p524_p5  ;;  %p546_p4 = scmp.lt.s32.totalorder %s544_s3, %s537_s20 }
  0x2a   : > { %p541_p11 = pneg %p540_p6  ;;  %p547_p10 = por %p546_p4, %p545_p9 }
  0x2c   : > { %p548_p12 = pnand %p547_p10, %p541_p11 }
  0x2e   : > { %551 = shalt.err (!%p548_p12)
}
  0x2f   : > { %455 = dma.hbm_to_vmem [thread:$0]  (!%p771_p0), %s763_s30, 128, %s767_s4, %s147_s6  }
  0x30   : > { %p946_p1 = scmp.lt.s32.totalorder %s668_s14, 3  ;;  %p947_p2 = scmp.ge.s32.totalorder %s668_s14, 1 }
  0x31   : > { %s816_s16 = scalar_lea.hbm %s937_s1, %s444_s27  ;;  %s172_s18 = scalar_lea.vmem [#allocation5], %s430_s26 }
  0x32   : > { %p807_p7 = pnand %p947_p2, %p946_p1  ;;  %s183_s19 = sshll.u32 %s172_s18, 4  ;;  %s184_s19 = int_to_ptr.vmem [resolvable:$true] %s183_s19 }
  0x33   : > { %s169_s30 = scalar_lea.sflag [#allocation6], %s754_s25  ;;  %s552_s4 = scalar_lea.hbm %s816_s16, 128 }
  0x34   : > { %s948_s7 = scalar_select %p807_p7, 1, 0 }
  0x35   : > { %p553_p9 = scmp.ne.s32.totalorder %s816_s16, %s552_s4  ;;  %s557_s27 = scalar_lea.hbm %s937_s1, 256 }
  0x36   : > { %p558_p3 = scmp.lt.u32.totalorder %s816_s16, %s937_s1  ;;  %p559_p6 = scmp.lt.u32.totalorder %s557_s27, %s552_s4 }
  0x37   : > { %p555_p11 = pnand %p553_p9, %p524_p5  ;;  %p561_p10 = scmp.lt.u32.totalorder %s552_s4, %s816_s16 }
  0x38   : > { %p560_p4 = por %p559_p6, %p558_p3 }
  0x39   : > { %p556_p13 = pneg %p555_p11 }
  0x3a   : > { %p562_p12 = por %p561_p10, %p560_p4 }
  0x3c   : > { %p563_p1 = pnand %p562_p12, %p556_p13 }
  0x3e   : > { %566 = shalt.err (!%p563_p1)
}
  0x3f   : > { %s567_s25 = scalar_lea.vmem %s184_s19, 128  ;;  %s671_s26 = smov [#allocation5]  }
  0x40   : > { %p568_p2 = scmp.ne.s32.totalorder %s184_s19, %s567_s25  ;;  %s572_s3 = sshll.u32 %s671_s26, 4  ;;  %s573_s3 = int_to_ptr.vmem [resolvable:$false] %s572_s3 }
  0x41   : > { %s574_s8 = scalar_lea.vmem %s573_s3, 256  ;;  %p575_p8 = scmp.lt.s32.totalorder %s184_s19, %s573_s3 }
  0x42   : > { %p570_p9 = pnand %p568_p2, %p524_p5  ;;  %p576_p7 = scmp.lt.s32.totalorder %s574_s8, %s567_s25 }
  0x44   : > { %p571_p11 = pneg %p570_p9  ;;  %p577_p3 = por %p576_p7, %p575_p8 }
  0x46   : > { %p578_p6 = pnand %p577_p3, %p571_p11 }
  0x48   : > { %581 = shalt.err (!%p578_p6)
}
  0x49   : > { %458 = dma.hbm_to_vmem [thread:$0]  (!%p771_p0), %s816_s16, 128, %s184_s19, %s169_s30  }
  0x4a   : > { %p949_p13 = scmp.ne.s32.totalorder %s948_s7, 0 }
  0x4b   : > { %s843_s15 = sand.u32 (!%p949_p13), 1, %s652_s10   ;;  %p950_p8 = scmp.ne.s32.totalorder (!%p949_p13), %s942_s21, 0 }
  0x4c   : > { %192 = sbr.rel (%p949_p13) target bundleno = 160 (0xa0), region = 28  ;;  %s437_s18 = sshll.u32 (!%p949_p13), %s843_s15, 3 }
  0x4d   : > { %s195_s4 = scalar_lea.sflag (!%p949_p13), [#allocation3], %s843_s15  ;;  %s847_s6 = scalar_lea.vmem (!%p949_p13), [#allocation2], %s437_s18 }
  0x53   : > { %635 = dma.done.wait (%p950_p8), %s195_s4, 128  }
  0x54   : > { %637 = vsyncadd (%p950_p8), %s195_s4, 4294967168  ;;  %s204_s5 = scalar_lea.sflag [#allocation6], %s843_s15  ;;  %s854_s7 = scalar_lea.vmem [#allocation5], %s437_s18 }
  0x55   : > { %639 = dma.done.wait (%p950_p8), %s204_s5, 128  }
  0x56   : > { %641 = vsyncadd (%p950_p8), %s204_s5, 4294967168  ;;  %s439_s16 = sshll.u32 %s843_s15, 1  ;;  %v672_v0 = vmov 0.0   ;;  %v243_v1 = vld [vmem:[%s854_s7] sm:$0x3]  ;;  %s441_s21 = sshll.u32 %s660_s12, 5 }
  0x57   : > { %s861_s19 = scalar_lea.vmem [#allocation7], %s439_s16  ;;  %v244_v2 = vmul.f32 1.442695, %v243_v1  ;;  %v255_v3 = vld [vmem:[%s854_s7 + $0x2] sm:$0x3]  ;;  %v246_v6 = vadd.f32 1.0, %v243_v1  ;;  %s886_s28 = scalar_lea.hbm %s938_s2, %s441_s21 }
  0x58   : > { %241 = vst [vmem:[%s861_s19] sm:$0x3] %v672_v0  ;;  %v242_v4 = vld [vmem:[%s847_s6] sm:$0x3]  ;;  %v256_v5 = vmul.f32 1.442695, %v255_v3  ;;  %v258_v11 = vadd.f32 1.0, %v255_v3 }
  0x59   : > { %514 = vpow2.f32 %v244_v2  ;;  %v247_v7 = vmul.f32 %v242_v4, %v242_v4  ;;  %v254_v8 = vld [vmem:[%s847_s6 + $0x2] sm:$0x3]  ;;  %v267_v10 = vld [vmem:[%s854_s7 + $0x4] sm:$0x3]  ;;  %v266_v21 = vld [vmem:[%s847_s6 + $0x4] sm:$0x3] }
  0x5a   : > { %516 = vpow2.f32 %v256_v5  ;;  %v259_v12 = vmul.f32 %v254_v8, %v254_v8  ;;  %v268_v14 = vmul.f32 1.442695, %v267_v10  ;;  %v279_v23 = vld [vmem:[%s854_s7 + $0x6] sm:$0x3]  ;;  %v270_v24 = vadd.f32 1.0, %v267_v10  ;;  %s312_s30 = sshll.u32 %s861_s19, 4  ;;  %s888_s30 = int_to_ptr.vmem [resolvable:$true] %s312_s30 }
  0x5b   : > { %v248_v9 = vsub.f32 %v246_v6, %v247_v7  ;;  %v271_v25 = vmul.f32 %v266_v21, %v266_v21  ;;  %v280_v26 = vmul.f32 1.442695, %v279_v23  ;;  %v278_v32 = vld [vmem:[%s847_s6 + $0x6] sm:$0x3]  ;;  %v282_v34 = vadd.f32 1.0, %v279_v23  ;;  %s297_s29 = scalar_lea.sflag [#allocation4], %s843_s15 }
  0x5c   : > { %v260_v18 = vsub.f32 %v258_v11, %v259_v12  ;;  %518 = vpow2.f32 %v268_v14  ;;  %v283_v35 = vmul.f32 %v278_v32, %v278_v32  ;;  %s582_s25 = scalar_lea.vmem %s888_s30, 32  ;;  %p951_p5 = scmp.ne.s32.totalorder %s943_s22, 0 }
  0x5d   : > { %v272_v28 = vsub.f32 %v270_v24, %v271_v25  ;;  %520 = vpow2.f32 %v280_v26  ;;  %p583_p0 = scmp.ne.s32.totalorder %s888_s30, %s582_s25  ;;  %s673_s12 = smov [#allocation7]  }
  0x5e   : > { %v284_v37 = vsub.f32 %v282_v34, %v283_v35  ;;  %s586_s26 = sshll.u32 %s673_s12, 4  ;;  %s587_s26 = int_to_ptr.vmem [resolvable:$false] %s586_s26 }
  0x5f   : > { %v251_v16 = vld [vmem:[%s861_s19] sm:$0x3]  ;;  %p584_p7 = pnand %p583_p0, %p951_p5  ;;  %s588_s3 = scalar_lea.vmem %s587_s26, 64 }
  0x60   : > { %p589_p10 = scmp.lt.s32.totalorder %s888_s30, %s587_s26  ;;  %p590_p12 = scmp.lt.s32.totalorder %s588_s3, %s582_s25 }
  0x61   : > { %p585_p4 = pneg %p584_p7 }
  0x62   : > { %p591_p1 = por %p590_p12, %p589_p10 }
  0x63   : > { %v515_v13 = vpop.eup %514 }
  0x64   : > { %v249_v15 = vsub.f32 %v248_v9, %v515_v13  ;;  %v517_v19 = vpop.eup %516  ;;  %p592_p2 = pnand %p591_p1, %p585_p4 }
  0x65   : > { %v261_v22 = vsub.f32 %v260_v18, %v517_v19 }
  0x66   : > { %v250_v17 = vmul.f32 -0.5, %v249_v15  ;;  %v519_v29 = vpop.eup %518 }
  0x67   : > { %v262_v27 = vmul.f32 -0.5, %v261_v22  ;;  %v273_v33 = vsub.f32 %v272_v28, %v519_v29  ;;  %v521_v38 = vpop.eup %520 }
  0x68   : > { %v252_v20 = vadd.f32 %v251_v16, %v250_v17  ;;  %v285_v41 = vsub.f32 %v284_v37, %v521_v38 }
  0x69   : > { %v274_v36 = vmul.f32 -0.5, %v273_v33 }
  0x6a   : > { %253 = vst [vmem:[%s861_s19] sm:$0x3] %v252_v20  ;;  %v286_v42 = vmul.f32 -0.5, %v285_v41 }
  0x71   : > { %v263_v30 = vld [vmem:[%s861_s19] sm:$0x3] }
  0x72   : > { %v264_v31 = vadd.f32 %v263_v30, %v262_v27 }
  0x74   : > { %265 = vst [vmem:[%s861_s19] sm:$0x3] %v264_v31 }
  0x7b   : > { %v275_v39 = vld [vmem:[%s861_s19] sm:$0x3] }
  0x7c   : > { %v276_v40 = vadd.f32 %v275_v39, %v274_v36 }
  0x7e   : > { %277 = vst [vmem:[%s861_s19] sm:$0x3] %v276_v40 }
  0x85   : > { %v287_v43 = vld [vmem:[%s861_s19] sm:$0x3] }
  0x86   : > { %v288_v44 = vadd.f32 %v287_v43, %v286_v42 }
  0x88   : > { %289 = vst [vmem:[%s861_s19] sm:$0x3] %v288_v44 }
  0x8f   : > { %v293_v45 = vld [vmem:[%s861_s19] sm:$0x3] }
  0x90   : > { %v294_v46 = vmul.f32 0.0009765625, %v293_v45 }
  0x92   : > { %295 = vst [vmem:[%s861_s19] sm:$0x3] %v294_v46 }
  0x93   : > { %595 = shalt.err (!%p592_p2)
}
  0x94   : > { %s596_s8 = scalar_lea.hbm %s886_s28, 32  ;;  %s600_s4 = scalar_lea.hbm %s938_s2, 64 }
  0x95   : > { %p597_p9 = scmp.ne.s32.totalorder %s886_s28, %s596_s8  ;;  %p601_p6 = scmp.lt.u32.totalorder %s886_s28, %s938_s2 }
  0x96   : > { %p602_p13 = scmp.lt.u32.totalorder %s600_s4, %s596_s8  ;;  %p604_p0 = scmp.lt.u32.totalorder %s596_s8, %s886_s28 }
  0x97   : > { %p598_p11 = pnand %p597_p9, %p951_p5 }
  0x98   : > { %p603_p8 = por %p602_p13, %p601_p6 }
  0x99   : > { %p599_p3 = pneg %p598_p11 }
  0x9a   : > { %p605_p7 = por %p604_p0, %p603_p8 }
  0x9c   : > { %p606_p4 = pnand %p605_p7, %p599_p3 }
  0x9e   : > { %609 = shalt.err (!%p606_p4)
}
  0x9f   : > { %450 = dma.vmem_to_hbm [thread:$0]  (%p951_p5), %s888_s30, 32, %s886_s28, %s297_s29  }
  0xa0 PF: > { %s324_s7 = sand.u32 1, %s648_s9   ;;  %p952_p10 = scmp.ne.s32.totalorder %s944_s24, 0 }
  0xa1   : > { %p953_p12 = scmp.ge.s32.totalorder %s668_s14, 2  ;;  %s325_s16 = scalar_lea.sflag [#allocation4], %s324_s7 }
  0xa3   : > { %p460_p1 = pnand %p953_p12, %p952_p10 }
  0xa5   : > { %643 = dma.done.wait (!%p460_p1), %s325_s16, 32  }
  0xa6   : > { %645 = vsyncadd (!%p460_p1), %s325_s16, 4294967264  ;;  %s21_s14 = sadd.s32 1, %s668_s14   ;;  %s954_s9 = smov %s652_s10 }
  0xa7   : > { %p18_p2 = scmp.ge.s32.totalorder %s21_s14, 4   ;;  %s955_s10 = smov %s656_s11 }
  0xa8   : > { %s956_s11 = smov %s745_s23  ;;  %s957_s12 = smov %s664_s13 }
  0xa9   : > { %s958_s13 = smov %s960_s17  ;;  %20 = sbr.rel (!%p18_p2) target bundleno = 8 (0x8), region = 94 }
  0xb0   :  { %330 = vsyncpa [#allocation3], 1 }
  0xb1   :  { %332 = vsyncpa [#allocation3 + $0x1], 1 }
  0xb2   :  { %333 = vsyncpa [#allocation6], 1 }
  0xb3   :  { %335 = vsyncpa [#allocation6 + $0x1], 1 }
  0xb4   :  { %336 = vsyncpa [#allocation4], 1 }
  0xb5   :  { %338 = vsyncpa [#allocation4 + $0x1], 1 }

</bundles_post_ra>
